<compile_context>
chip_gen: v7x
topology: tpu7x:2x2x1
jax: 0.10.0
libtpu: 0.0.40
codegen_flags: <defaults>
</compile_context>

<pallas_src>
import numpy as np
import jax
import jax.numpy as jnp
from jax import lax
from jax.experimental import pallas as pl
from jax.experimental.pallas import tpu as pltpu

EPS = 1e-5
K = 4
STRIDE = 2
PAD = 1


def _round_up(x, m):
    return ((x + m - 1) // m) * m


def _col_chunks(total, c_out, target_elems=64 * 1024):
    """Static [c0, c1) bounds over the flat spatial axis so each f32 (C_out, chunk)
    temporary stays ~<= target_elems (bounds vreg/VMEM pressure in compute + finalize)."""
    chunk = max(1, target_elems // max(int(c_out), 1))
    if chunk >= total:
        return [(0, total)]
    if chunk >= 256:
        chunk = (chunk // 128) * 128          # keep chunk boundaries lane-aligned when possible
    return [(c0, min(c0 + chunk, total)) for c0 in range(0, total, chunk)]


def _make_unet_up_kernel(Wp, n_valid, chunks):
    """Kernel factory.  Static config:
      Wp      : padded input row length (W + 2) = row stride of both flat layouts
      n_valid : valid output positions per (n, c) = Ho*Wo = 4*H*W
      chunks  : static [c0, c1) bounds tiling the flat output axis Lo = H*Wp
    """
    inv_count = 1.0 / float(n_valid)

    def kernel(x_ref, w_ref, mask_ref, o_ref):
        # x_ref:    (1, C_in, Lp_pad)    bf16  zero-padded input image, flattened (resident)
        # w_ref:    (4, 4, C_out, C_in)  bf16  per-(phase, tap) correlation weights (resident)
        # mask_ref: (1, Lo)              f32   1.0 on valid output columns (col < W)
        # o_ref:    (1, 4, C_out, Lo)    bf16  per-batch resident, phase-major output
        c_out = o_ref.shape[2]
        s = jnp.zeros((c_out, 1), jnp.float32)
        sq = jnp.zeros((c_out, 1), jnp.float32)

        # -- pass 1: phase matmuls; each tap operand is a shifted view of the SAME resident x --
        for p in range(4):                      # phase = 2*ph + pw  -> output pixel (2a+ph, 2b+pw)
            ph, pw = p // 2, p % 2
            for (c0, c1) in chunks:
                cw = c1 - c0
                y = None
                for t in range(4):              # tap = 2*di + dj
                    di, dj = t // 2, t % 2
                    off = (ph + di) * Wp + (pw + dj) + c0   # static flat shift of this tap
                    part = jnp.dot(w_ref[p, t], x_ref[0, :, off:off + cw],
                                   preferred_element_type=jnp.float32)
                    y = part if y is None else y + part
                o_ref[0, p, :, c0:c1] = y.astype(o_ref.dtype)
                # InstanceNorm stats from the un-rounded f32 results; garbage columns masked.
                ym = y * mask_ref[:, c0:c1]
                s = s + jnp.sum(ym, axis=-1, keepdims=True)
                sq = sq + jnp.sum(ym * y, axis=-1, keepdims=True)

        # -- pass 2: InstanceNorm + ReLU, normalized in place chunk-by-chunk (bounded temps) --
        mean = s * inv_count
        var = jnp.maximum(sq * inv_count - mean * mean, 0.0)   # clamp f32 cancellation
        inv_std = lax.rsqrt(var + EPS)                         # EUP slot
        for p in range(4):
            for (c0, c1) in chunks:
                yb = o_ref[0, p, :, c0:c1].astype(jnp.float32)
                o_ref[0, p, :, c0:c1] = jnp.maximum((yb - mean) * inv_std, 0.0).astype(o_ref.dtype)

    return kernel


@jax.jit
def unet_up_loc_forward(x_nchw, skip_nchw, weight):
    """Forward pass matching UNetUpLoc.forward(x, skip_input) (dropout=0).

    x_nchw:    (N, C_in,  H,  W)   float32
    skip_nchw: (N, C_skip, 2H, 2W) float32
    weight:    (C_in, C_out, 4, 4) float32  (PyTorch ConvTranspose2d layout)
    returns:   (N, C_out + C_skip, 2H, 2W) float32
    """
    N, C_in, H, W = x_nchw.shape
    C_out = weight.shape[1]
    Ho, Wo = STRIDE * H, STRIDE * W
    Hp, Wp = H + 2, W + 2
    Lp = Hp * Wp                              # padded image, flattened
    Lo = H * Wp                               # flat output per phase (row stride Wp, 2 garbage cols/row)
    Lp_pad = _round_up(Lp + 2, 128)           # +2 so the largest tap shift stays in bounds

    # --- input: raw zero-padded x, flattened.  ~1x HBM traffic (no 16x im2col expansion). ---
    xp = jnp.pad(x_nchw, ((0, 0), (0, 0), (1, 1), (1, 1))).reshape(N, C_in, Lp)
    x_flat = jnp.pad(xp, ((0, 0), (0, 0), (0, Lp_pad - Lp))).astype(jnp.bfloat16)

    # --- weights: w_taps[2*ph+pw, 2*di+dj, co, ci] = weight[ci, co, 3-ph-2di, 3-pw-2dj] ---
    wf = jnp.transpose(weight, (2, 3, 1, 0))[::-1, ::-1]       # [kh', kw', co, ci] = w[.., 3-kh', 3-kw']
    wf = wf.reshape(2, 2, 2, 2, C_out, C_in)                   # (di, ph, dj, pw, co, ci)
    w_taps = jnp.transpose(wf, (1, 3, 0, 2, 4, 5)).reshape(4, 4, C_out, C_in).astype(jnp.bfloat16)

    # --- validity mask over the row-padded flat output layout (col < W) ---
    mask = ((jnp.arange(Lo, dtype=jnp.int32) % Wp) < W).astype(jnp.float32).reshape(1, Lo)

    chunks = _col_chunks(Lo, C_out)
    kernel = _make_unet_up_kernel(Wp, 4 * H * W, chunks)

    # --- VMEM budget: actual (double-buffered) block footprint + temp slack, capped by HW. ---
    bf = 2
    vmem_need = (2 * C_in * Lp_pad * bf            # x blocks
                 + 2 * 16 * C_out * C_in * bf      # weight blocks
                 + 2 * 4 * C_out * Lo * bf         # per-batch resident bf16 output blocks
                 + 2 * Lo * 4                      # mask
                 + 4 * 1024 * 1024)                # matmul / finalize temporaries + slack
    try:
        vmem_cap = int(pltpu.get_tpu_info().vmem_capacity_bytes)
    except Exception:
        vmem_cap = 64 * 1024 * 1024
    vmem_limit = int(max(16 * 1024 * 1024, min(vmem_need, int(vmem_cap * 0.9))))
    # TODO(synk): for very large C_out*H*W the per-batch-resident bf16 output no longer fits
    # VMEM; switch to a two-pass (stats pass + normalize pass) spatially tiled pipeline there.

    flops = 2 * N * 4 * 4 * C_out * C_in * Lo
    bytes_accessed = int(x_flat.size * bf + w_taps.size * bf + mask.size * 4
                         + N * 4 * C_out * Lo * bf)

    y_phases = pl.pallas_call(
        kernel,
        out_shape=jax.ShapeDtypeStruct((N, 4, C_out, Lo), jnp.bfloat16),
        grid_spec=pltpu.PrefetchScalarGridSpec(
            num_scalar_prefetch=0,
            grid=(N,),
            in_specs=[
                pl.BlockSpec((1, C_in, Lp_pad), lambda n: (n, 0, 0)),
                pl.BlockSpec((4, 4, C_out, C_in), lambda n: (0, 0, 0, 0)),
                pl.BlockSpec((1, Lo), lambda n: (0, 0)),
            ],
            out_specs=pl.BlockSpec((1, 4, C_out, Lo), lambda n: (n, 0, 0, 0)),
        ),
        compiler_params=pltpu.CompilerParams(
            dimension_semantics=("parallel",),
            vmem_limit_bytes=vmem_limit),
        cost_estimate=pl.CostEstimate(flops=flops, transcendentals=N * C_out,
                                      bytes_accessed=bytes_accessed),
    )(x_flat, w_taps, mask)

    # --- epilogue (bf16 => half the bytes of v2): drop garbage cols, pixel-shuffle, concat. ---
    yp = y_phases.reshape(N, 2, 2, C_out, H, Wp)[..., :W]       # (N, ph, pw, co, a, b)
    y = jnp.transpose(yp, (0, 3, 4, 1, 5, 2)).reshape(N, C_out, Ho, Wo)
    return jnp.concatenate([y.astype(x_nchw.dtype), skip_nchw], axis=1)


def reference_forward(x, skip, weight):
    # Pure-JAX reference matching PyTorch semantics exactly.
    w_t = jnp.transpose(weight[:, :, ::-1, ::-1], (1, 0, 2, 3))   # (C_out, C_in, K, K)
    y = lax.conv_general_dilated(
        x, w_t, window_strides=(1, 1),
        padding=[(K - 1 - PAD, K - 1 - PAD)] * 2,
        lhs_dilation=(STRIDE, STRIDE),
        dimension_numbers=('NCHW', 'OIHW', 'NCHW'))
    mean = jnp.mean(y, axis=(2, 3), keepdims=True)
    var = jnp.mean((y - mean) ** 2, axis=(2, 3), keepdims=True)
    y = (y - mean) / jnp.sqrt(var + EPS)
    y = jnp.maximum(y, 0.0)
    return jnp.concatenate([y, skip], axis=1)


if __name__ == "__main__":
    # Small, deterministic example shapes.
    N, C_in, C_out, H, W = 2, 8, 4, 8, 8
    C_skip = 4
    key = jax.random.PRNGKey(0)
    kx, ks, kw = jax.random.split(key, 3)
    x = jax.random.normal(kx, (N, C_in, H, W), jnp.float32)
    skip = jax.random.normal(ks, (N, C_skip, STRIDE * H, STRIDE * W), jnp.float32)
    weight = 0.1 * jax.random.normal(kw, (C_in, C_out, K, K), jnp.float32)

    out = jax.block_until_ready(unet_up_loc_forward(x, skip, weight))

    ref = reference_forward(x, skip, weight)
    np.testing.assert_allclose(np.asarray(out), np.asarray(ref), rtol=2e-2, atol=2e-2)
    assert out.shape == (N, C_out + C_skip, STRIDE * H, STRIDE * W)
    print("KERNEL_OK")
</pallas_src>

<mosaic_0001>
module attributes {stable_mosaic.version = 11 : i64} {
  func.func @kernel(%arg0: i32, %arg1: memref<1x8x128xbf16, #tpu.memory_space<vmem>>, %arg2: memref<4x4x4x8xbf16, #tpu.memory_space<vmem>>, %arg3: memref<1x80xf32, #tpu.memory_space<vmem>>, %arg4: memref<1x4x4x80xbf16, #tpu.memory_space<vmem>>) attributes {dimension_semantics = [#tpu.dimension_semantics<parallel>], iteration_bounds = array<i64: 2>, scalar_prefetch = 0 : i64, scratch_operands = 0 : i64, tpu.core_type = #tpu.core_type<tc>, window_params = [{transform_indices = @transform_0, window_bounds = array<i64: 1, 8, 128>}, {pipeline_mode = #tpu.pipeline_mode<synchronous>, transform_indices = @transform_1, window_bounds = array<i64: 4, 4, 4, 8>}, {pipeline_mode = #tpu.pipeline_mode<synchronous>, transform_indices = @transform_2, window_bounds = array<i64: 1, 80>}, {transform_indices = @transform_3, window_bounds = array<i64: 1, 4, 4, 80>}]} {
    %cst = arith.constant 0.000000e+00 : f32
    %0 = vector.broadcast %cst : f32 to vector<4x1xf32>
    %cst_0 = arith.constant 0.000000e+00 : f32
    %1 = vector.broadcast %cst_0 : f32 to vector<4x1xf32>
    %c0 = arith.constant 0 : index
    %c0_1 = arith.constant 0 : index
    %c0_2 = arith.constant 0 : index
    %c0_3 = arith.constant 0 : index
    %2 = vector.load %arg2[%c0, %c0_1, %c0_2, %c0_3] : memref<4x4x4x8xbf16, #tpu.memory_space<vmem>>, vector<1x1x4x8xbf16>
    %3 = vector.shape_cast %2 : vector<1x1x4x8xbf16> to vector<4x8xbf16>
    %c0_4 = arith.constant 0 : index
    %c0_5 = arith.constant 0 : index
    %c0_6 = arith.constant 0 : index
    %4 = vector.load %arg1[%c0_4, %c0_5, %c0_6] : memref<1x8x128xbf16, #tpu.memory_space<vmem>>, vector<1x8x80xbf16>
    %5 = vector.shape_cast %4 : vector<1x8x80xbf16> to vector<8x80xbf16>
    %cst_7 = arith.constant dense<0.000000e+00> : vector<4x80xf32>
    %6 = tpu.matmul %3, %5, %cst_7 {dimension_numbers = #tpu.dot_dimension_numbers<[1], [0], [0], [1], [0, 0, 1, 1], [], []>} : vector<4x8xbf16>, vector<8x80xbf16>, vector<4x80xf32> -> vector<4x80xf32>
    %c0_8 = arith.constant 0 : index
    %c1 = arith.constant 1 : index
    %c0_9 = arith.constant 0 : index
    %c0_10 = arith.constant 0 : index
    %7 = vector.load %arg2[%c0_8, %c1, %c0_9, %c0_10] : memref<4x4x4x8xbf16, #tpu.memory_space<vmem>>, vector<1x1x4x8xbf16>
    %8 = vector.shape_cast %7 : vector<1x1x4x8xbf16> to vector<4x8xbf16>
    %c0_11 = arith.constant 0 : index
    %c0_12 = arith.constant 0 : index
    %c1_13 = arith.constant 1 : index
    %9 = vector.load %arg1[%c0_11, %c0_12, %c1_13] : memref<1x8x128xbf16, #tpu.memory_space<vmem>>, vector<1x8x80xbf16>
    %10 = vector.shape_cast %9 : vector<1x8x80xbf16> to vector<8x80xbf16>
    %cst_14 = arith.constant dense<0.000000e+00> : vector<4x80xf32>
    %11 = tpu.matmul %8, %10, %cst_14 {dimension_numbers = #tpu.dot_dimension_numbers<[1], [0], [0], [1], [0, 0, 1, 1], [], []>} : vector<4x8xbf16>, vector<8x80xbf16>, vector<4x80xf32> -> vector<4x80xf32>
    %12 = arith.addf %6, %11 : vector<4x80xf32>
    %c0_15 = arith.constant 0 : index
    %c2 = arith.constant 2 : index
    %c0_16 = arith.constant 0 : index
    %c0_17 = arith.constant 0 : index
    %13 = vector.load %arg2[%c0_15, %c2, %c0_16, %c0_17] : memref<4x4x4x8xbf16, #tpu.memory_space<vmem>>, vector<1x1x4x8xbf16>
    %14 = vector.shape_cast %13 : vector<1x1x4x8xbf16> to vector<4x8xbf16>
    %c0_18 = arith.constant 0 : index
    %c0_19 = arith.constant 0 : index
    %c10 = arith.constant 10 : index
    %15 = vector.load %arg1[%c0_18, %c0_19, %c10] : memref<1x8x128xbf16, #tpu.memory_space<vmem>>, vector<1x8x80xbf16>
    %16 = vector.shape_cast %15 : vector<1x8x80xbf16> to vector<8x80xbf16>
    %cst_20 = arith.constant dense<0.000000e+00> : vector<4x80xf32>
    %17 = tpu.matmul %14, %16, %cst_20 {dimension_numbers = #tpu.dot_dimension_numbers<[1], [0], [0], [1], [0, 0, 1, 1], [], []>} : vector<4x8xbf16>, vector<8x80xbf16>, vector<4x80xf32> -> vector<4x80xf32>
    %18 = arith.addf %12, %17 : vector<4x80xf32>
    %c0_21 = arith.constant 0 : index
    %c3 = arith.constant 3 : index
    %c0_22 = arith.constant 0 : index
    %c0_23 = arith.constant 0 : index
    %19 = vector.load %arg2[%c0_21, %c3, %c0_22, %c0_23] : memref<4x4x4x8xbf16, #tpu.memory_space<vmem>>, vector<1x1x4x8xbf16>
    %20 = vector.shape_cast %19 : vector<1x1x4x8xbf16> to vector<4x8xbf16>
    %c0_24 = arith.constant 0 : index
    %c0_25 = arith.constant 0 : index
    %c11 = arith.constant 11 : index
    %21 = vector.load %arg1[%c0_24, %c0_25, %c11] : memref<1x8x128xbf16, #tpu.memory_space<vmem>>, vector<1x8x80xbf16>
    %22 = vector.shape_cast %21 : vector<1x8x80xbf16> to vector<8x80xbf16>
    %cst_26 = arith.constant dense<0.000000e+00> : vector<4x80xf32>
    %23 = tpu.matmul %20, %22, %cst_26 {dimension_numbers = #tpu.dot_dimension_numbers<[1], [0], [0], [1], [0, 0, 1, 1], [], []>} : vector<4x8xbf16>, vector<8x80xbf16>, vector<4x80xf32> -> vector<4x80xf32>
    %24 = arith.addf %18, %23 : vector<4x80xf32>
    %25 = arith.truncf %24 : vector<4x80xf32> to vector<4x80xbf16>
    %c0_27 = arith.constant 0 : index
    %c0_28 = arith.constant 0 : index
    %c0_29 = arith.constant 0 : index
    %c0_30 = arith.constant 0 : index
    %26 = vector.load %arg4[%c0_27, %c0_28, %c0_29, %c0_30] : memref<1x4x4x80xbf16, #tpu.memory_space<vmem>>, vector<1x1x4x80xbf16>
    %27 = vector.shape_cast %26 : vector<1x1x4x80xbf16> to vector<4x80xbf16>
    %28 = vector.shape_cast %25 : vector<4x80xbf16> to vector<1x1x4x80xbf16>
    tpu.vector_store %arg4[%c0_27, %c0_28, %c0_29, %c0_30], %28 {strides = array<i32>} : memref<1x4x4x80xbf16, #tpu.memory_space<vmem>>, vector<1x1x4x80xbf16>,
    %c0_31 = arith.constant 0 : index
    %c0_32 = arith.constant 0 : index
    %29 = vector.load %arg3[%c0_31, %c0_32] : memref<1x80xf32, #tpu.memory_space<vmem>>, vector<1x80xf32>
    %30 = vector.broadcast %29 : vector<1x80xf32> to vector<4x80xf32>
    %31 = arith.mulf %24, %30 : vector<4x80xf32>
    %cst_33 = arith.constant dense<0.000000e+00> : vector<4xf32>
    %32 = vector.multi_reduction <add>, %31, %cst_33 [1] : vector<4x80xf32> to vector<4xf32>
    %33 = vector.shape_cast %32 : vector<4xf32> to vector<4x1xf32>
    %34 = arith.addf %0, %33 : vector<4x1xf32>
    %35 = arith.mulf %31, %24 : vector<4x80xf32>
    %cst_34 = arith.constant dense<0.000000e+00> : vector<4xf32>
    %36 = vector.multi_reduction <add>, %35, %cst_34 [1] : vector<4x80xf32> to vector<4xf32>
    %37 = vector.shape_cast %36 : vector<4xf32> to vector<4x1xf32>
    %38 = arith.addf %1, %37 : vector<4x1xf32>
    %c1_35 = arith.constant 1 : index
    %c0_36 = arith.constant 0 : index
    %c0_37 = arith.constant 0 : index
    %c0_38 = arith.constant 0 : index
    %39 = vector.load %arg2[%c1_35, %c0_36, %c0_37, %c0_38] : memref<4x4x4x8xbf16, #tpu.memory_space<vmem>>, vector<1x1x4x8xbf16>
    %40 = vector.shape_cast %39 : vector<1x1x4x8xbf16> to vector<4x8xbf16>
    %c0_39 = arith.constant 0 : index
    %c0_40 = arith.constant 0 : index
    %c1_41 = arith.constant 1 : index
    %41 = vector.load %arg1[%c0_39, %c0_40, %c1_41] : memref<1x8x128xbf16, #tpu.memory_space<vmem>>, vector<1x8x80xbf16>
    %42 = vector.shape_cast %41 : vector<1x8x80xbf16> to vector<8x80xbf16>
    %cst_42 = arith.constant dense<0.000000e+00> : vector<4x80xf32>
    %43 = tpu.matmul %40, %42, %cst_42 {dimension_numbers = #tpu.dot_dimension_numbers<[1], [0], [0], [1], [0, 0, 1, 1], [], []>} : vector<4x8xbf16>, vector<8x80xbf16>, vector<4x80xf32> -> vector<4x80xf32>
    %c1_43 = arith.constant 1 : index
    %c1_44 = arith.constant 1 : index
    %c0_45 = arith.constant 0 : index
    %c0_46 = arith.constant 0 : index
    %44 = vector.load %arg2[%c1_43, %c1_44, %c0_45, %c0_46] : memref<4x4x4x8xbf16, #tpu.memory_space<vmem>>, vector<1x1x4x8xbf16>
    %45 = vector.shape_cast %44 : vector<1x1x4x8xbf16> to vector<4x8xbf16>
    %c0_47 = arith.constant 0 : index
    %c0_48 = arith.constant 0 : index
    %c2_49 = arith.constant 2 : index
    %46 = vector.load %arg1[%c0_47, %c0_48, %c2_49] : memref<1x8x128xbf16, #tpu.memory_space<vmem>>, vector<1x8x80xbf16>
    %47 = vector.shape_cast %46 : vector<1x8x80xbf16> to vector<8x80xbf16>
    %cst_50 = arith.constant dense<0.000000e+00> : vector<4x80xf32>
    %48 = tpu.matmul %45, %47, %cst_50 {dimension_numbers = #tpu.dot_dimension_numbers<[1], [0], [0], [1], [0, 0, 1, 1], [], []>} : vector<4x8xbf16>, vector<8x80xbf16>, vector<4x80xf32> -> vector<4x80xf32>
    %49 = arith.addf %43, %48 : vector<4x80xf32>
    %c1_51 = arith.constant 1 : index
    %c2_52 = arith.constant 2 : index
    %c0_53 = arith.constant 0 : index
    %c0_54 = arith.constant 0 : index
    %50 = vector.load %arg2[%c1_51, %c2_52, %c0_53, %c0_54] : memref<4x4x4x8xbf16, #tpu.memory_space<vmem>>, vector<1x1x4x8xbf16>
    %51 = vector.shape_cast %50 : vector<1x1x4x8xbf16> to vector<4x8xbf16>
    %c0_55 = arith.constant 0 : index
    %c0_56 = arith.constant 0 : index
    %c11_57 = arith.constant 11 : index
    %52 = vector.load %arg1[%c0_55, %c0_56, %c11_57] : memref<1x8x128xbf16, #tpu.memory_space<vmem>>, vector<1x8x80xbf16>
    %53 = vector.shape_cast %52 : vector<1x8x80xbf16> to vector<8x80xbf16>
    %cst_58 = arith.constant dense<0.000000e+00> : vector<4x80xf32>
    %54 = tpu.matmul %51, %53, %cst_58 {dimension_numbers = #tpu.dot_dimension_numbers<[1], [0], [0], [1], [0, 0, 1, 1], [], []>} : vector<4x8xbf16>, vector<8x80xbf16>, vector<4x80xf32> -> vector<4x80xf32>
    %55 = arith.addf %49, %54 : vector<4x80xf32>
    %c1_59 = arith.constant 1 : index
    %c3_60 = arith.constant 3 : index
    %c0_61 = arith.constant 0 : index
    %c0_62 = arith.constant 0 : index
    %56 = vector.load %arg2[%c1_59, %c3_60, %c0_61, %c0_62] : memref<4x4x4x8xbf16, #tpu.memory_space<vmem>>, vector<1x1x4x8xbf16>
    %57 = vector.shape_cast %56 : vector<1x1x4x8xbf16> to vector<4x8xbf16>
    %c0_63 = arith.constant 0 : index
    %c0_64 = arith.constant 0 : index
    %c12 = arith.constant 12 : index
    %58 = vector.load %arg1[%c0_63, %c0_64, %c12] : memref<1x8x128xbf16, #tpu.memory_space<vmem>>, vector<1x8x80xbf16>
    %59 = vector.shape_cast %58 : vector<1x8x80xbf16> to vector<8x80xbf16>
    %cst_65 = arith.constant dense<0.000000e+00> : vector<4x80xf32>
    %60 = tpu.matmul %57, %59, %cst_65 {dimension_numbers = #tpu.dot_dimension_numbers<[1], [0], [0], [1], [0, 0, 1, 1], [], []>} : vector<4x8xbf16>, vector<8x80xbf16>, vector<4x80xf32> -> vector<4x80xf32>
    %61 = arith.addf %55, %60 : vector<4x80xf32>
    %62 = arith.truncf %61 : vector<4x80xf32> to vector<4x80xbf16>
    %c0_66 = arith.constant 0 : index
    %c1_67 = arith.constant 1 : index
    %c0_68 = arith.constant 0 : index
    %c0_69 = arith.constant 0 : index
    %63 = vector.load %arg4[%c0_66, %c1_67, %c0_68, %c0_69] : memref<1x4x4x80xbf16, #tpu.memory_space<vmem>>, vector<1x1x4x80xbf16>
    %64 = vector.shape_cast %63 : vector<1x1x4x80xbf16> to vector<4x80xbf16>
    %65 = vector.shape_cast %62 : vector<4x80xbf16> to vector<1x1x4x80xbf16>
    tpu.vector_store %arg4[%c0_66, %c1_67, %c0_68, %c0_69], %65 {strides = array<i32>} : memref<1x4x4x80xbf16, #tpu.memory_space<vmem>>, vector<1x1x4x80xbf16>,
    %c0_70 = arith.constant 0 : index
    %c0_71 = arith.constant 0 : index
    %66 = vector.load %arg3[%c0_70, %c0_71] : memref<1x80xf32, #tpu.memory_space<vmem>>, vector<1x80xf32>
    %67 = vector.broadcast %66 : vector<1x80xf32> to vector<4x80xf32>
    %68 = arith.mulf %61, %67 : vector<4x80xf32>
    %cst_72 = arith.constant dense<0.000000e+00> : vector<4xf32>
    %69 = vector.multi_reduction <add>, %68, %cst_72 [1] : vector<4x80xf32> to vector<4xf32>
    %70 = vector.shape_cast %69 : vector<4xf32> to vector<4x1xf32>
    %71 = arith.addf %34, %70 : vector<4x1xf32>
    %72 = arith.mulf %68, %61 : vector<4x80xf32>
    %cst_73 = arith.constant dense<0.000000e+00> : vector<4xf32>
    %73 = vector.multi_reduction <add>, %72, %cst_73 [1] : vector<4x80xf32> to vector<4xf32>
    %74 = vector.shape_cast %73 : vector<4xf32> to vector<4x1xf32>
    %75 = arith.addf %38, %74 : vector<4x1xf32>
    %c2_74 = arith.constant 2 : index
    %c0_75 = arith.constant 0 : index
    %c0_76 = arith.constant 0 : index
    %c0_77 = arith.constant 0 : index
    %76 = vector.load %arg2[%c2_74, %c0_75, %c0_76, %c0_77] : memref<4x4x4x8xbf16, #tpu.memory_space<vmem>>, vector<1x1x4x8xbf16>
    %77 = vector.shape_cast %76 : vector<1x1x4x8xbf16> to vector<4x8xbf16>
    %c0_78 = arith.constant 0 : index
    %c0_79 = arith.constant 0 : index
    %c10_80 = arith.constant 10 : index
    %78 = vector.load %arg1[%c0_78, %c0_79, %c10_80] : memref<1x8x128xbf16, #tpu.memory_space<vmem>>, vector<1x8x80xbf16>
    %79 = vector.shape_cast %78 : vector<1x8x80xbf16> to vector<8x80xbf16>
    %cst_81 = arith.constant dense<0.000000e+00> : vector<4x80xf32>
    %80 = tpu.matmul %77, %79, %cst_81 {dimension_numbers = #tpu.dot_dimension_numbers<[1], [0], [0], [1], [0, 0, 1, 1], [], []>} : vector<4x8xbf16>, vector<8x80xbf16>, vector<4x80xf32> -> vector<4x80xf32>
    %c2_82 = arith.constant 2 : index
    %c1_83 = arith.constant 1 : index
    %c0_84 = arith.constant 0 : index
    %c0_85 = arith.constant 0 : index
    %81 = vector.load %arg2[%c2_82, %c1_83, %c0_84, %c0_85] : memref<4x4x4x8xbf16, #tpu.memory_space<vmem>>, vector<1x1x4x8xbf16>
    %82 = vector.shape_cast %81 : vector<1x1x4x8xbf16> to vector<4x8xbf16>
    %c0_86 = arith.constant 0 : index
    %c0_87 = arith.constant 0 : index
    %c11_88 = arith.constant 11 : index
    %83 = vector.load %arg1[%c0_86, %c0_87, %c11_88] : memref<1x8x128xbf16, #tpu.memory_space<vmem>>, vector<1x8x80xbf16>
    %84 = vector.shape_cast %83 : vector<1x8x80xbf16> to vector<8x80xbf16>
    %cst_89 = arith.constant dense<0.000000e+00> : vector<4x80xf32>
    %85 = tpu.matmul %82, %84, %cst_89 {dimension_numbers = #tpu.dot_dimension_numbers<[1], [0], [0], [1], [0, 0, 1, 1], [], []>} : vector<4x8xbf16>, vector<8x80xbf16>, vector<4x80xf32> -> vector<4x80xf32>
    %86 = arith.addf %80, %85 : vector<4x80xf32>
    %c2_90 = arith.constant 2 : index
    %c2_91 = arith.constant 2 : index
    %c0_92 = arith.constant 0 : index
    %c0_93 = arith.constant 0 : index
    %87 = vector.load %arg2[%c2_90, %c2_91, %c0_92, %c0_93] : memref<4x4x4x8xbf16, #tpu.memory_space<vmem>>, vector<1x1x4x8xbf16>
    %88 = vector.shape_cast %87 : vector<1x1x4x8xbf16> to vector<4x8xbf16>
    %c0_94 = arith.constant 0 : index
    %c0_95 = arith.constant 0 : index
    %c20 = arith.constant 20 : index
    %89 = vector.load %arg1[%c0_94, %c0_95, %c20] : memref<1x8x128xbf16, #tpu.memory_space<vmem>>, vector<1x8x80xbf16>
    %90 = vector.shape_cast %89 : vector<1x8x80xbf16> to vector<8x80xbf16>
    %cst_96 = arith.constant dense<0.000000e+00> : vector<4x80xf32>
    %91 = tpu.matmul %88, %90, %cst_96 {dimension_numbers = #tpu.dot_dimension_numbers<[1], [0], [0], [1], [0, 0, 1, 1], [], []>} : vector<4x8xbf16>, vector<8x80xbf16>, vector<4x80xf32> -> vector<4x80xf32>
    %92 = arith.addf %86, %91 : vector<4x80xf32>
    %c2_97 = arith.constant 2 : index
    %c3_98 = arith.constant 3 : index
    %c0_99 = arith.constant 0 : index
    %c0_100 = arith.constant 0 : index
    %93 = vector.load %arg2[%c2_97, %c3_98, %c0_99, %c0_100] : memref<4x4x4x8xbf16, #tpu.memory_space<vmem>>, vector<1x1x4x8xbf16>
    %94 = vector.shape_cast %93 : vector<1x1x4x8xbf16> to vector<4x8xbf16>
    %c0_101 = arith.constant 0 : index
    %c0_102 = arith.constant 0 : index
    %c21 = arith.constant 21 : index
    %95 = vector.load %arg1[%c0_101, %c0_102, %c21] : memref<1x8x128xbf16, #tpu.memory_space<vmem>>, vector<1x8x80xbf16>
    %96 = vector.shape_cast %95 : vector<1x8x80xbf16> to vector<8x80xbf16>
    %cst_103 = arith.constant dense<0.000000e+00> : vector<4x80xf32>
    %97 = tpu.matmul %94, %96, %cst_103 {dimension_numbers = #tpu.dot_dimension_numbers<[1], [0], [0], [1], [0, 0, 1, 1], [], []>} : vector<4x8xbf16>, vector<8x80xbf16>, vector<4x80xf32> -> vector<4x80xf32>
    %98 = arith.addf %92, %97 : vector<4x80xf32>
    %99 = arith.truncf %98 : vector<4x80xf32> to vector<4x80xbf16>
    %c0_104 = arith.constant 0 : index
    %c2_105 = arith.constant 2 : index
    %c0_106 = arith.constant 0 : index
    %c0_107 = arith.constant 0 : index
    %100 = vector.load %arg4[%c0_104, %c2_105, %c0_106, %c0_107] : memref<1x4x4x80xbf16, #tpu.memory_space<vmem>>, vector<1x1x4x80xbf16>
    %101 = vector.shape_cast %100 : vector<1x1x4x80xbf16> to vector<4x80xbf16>
    %102 = vector.shape_cast %99 : vector<4x80xbf16> to vector<1x1x4x80xbf16>
    tpu.vector_store %arg4[%c0_104, %c2_105, %c0_106, %c0_107], %102 {strides = array<i32>} : memref<1x4x4x80xbf16, #tpu.memory_space<vmem>>, vector<1x1x4x80xbf16>,
    %c0_108 = arith.constant 0 : index
    %c0_109 = arith.constant 0 : index
    %103 = vector.load %arg3[%c0_108, %c0_109] : memref<1x80xf32, #tpu.memory_space<vmem>>, vector<1x80xf32>
    %104 = vector.broadcast %103 : vector<1x80xf32> to vector<4x80xf32>
    %105 = arith.mulf %98, %104 : vector<4x80xf32>
    %cst_110 = arith.constant dense<0.000000e+00> : vector<4xf32>
    %106 = vector.multi_reduction <add>, %105, %cst_110 [1] : vector<4x80xf32> to vector<4xf32>
    %107 = vector.shape_cast %106 : vector<4xf32> to vector<4x1xf32>
    %108 = arith.addf %71, %107 : vector<4x1xf32>
    %109 = arith.mulf %105, %98 : vector<4x80xf32>
    %cst_111 = arith.constant dense<0.000000e+00> : vector<4xf32>
    %110 = vector.multi_reduction <add>, %109, %cst_111 [1] : vector<4x80xf32> to vector<4xf32>
    %111 = vector.shape_cast %110 : vector<4xf32> to vector<4x1xf32>
    %112 = arith.addf %75, %111 : vector<4x1xf32>
    %c3_112 = arith.constant 3 : index
    %c0_113 = arith.constant 0 : index
    %c0_114 = arith.constant 0 : index
    %c0_115 = arith.constant 0 : index
    %113 = vector.load %arg2[%c3_112, %c0_113, %c0_114, %c0_115] : memref<4x4x4x8xbf16, #tpu.memory_space<vmem>>, vector<1x1x4x8xbf16>
    %114 = vector.shape_cast %113 : vector<1x1x4x8xbf16> to vector<4x8xbf16>
    %c0_116 = arith.constant 0 : index
    %c0_117 = arith.constant 0 : index
    %c11_118 = arith.constant 11 : index
    %115 = vector.load %arg1[%c0_116, %c0_117, %c11_118] : memref<1x8x128xbf16, #tpu.memory_space<vmem>>, vector<1x8x80xbf16>
    %116 = vector.shape_cast %115 : vector<1x8x80xbf16> to vector<8x80xbf16>
    %cst_119 = arith.constant dense<0.000000e+00> : vector<4x80xf32>
    %117 = tpu.matmul %114, %116, %cst_119 {dimension_numbers = #tpu.dot_dimension_numbers<[1], [0], [0], [1], [0, 0, 1, 1], [], []>} : vector<4x8xbf16>, vector<8x80xbf16>, vector<4x80xf32> -> vector<4x80xf32>
    %c3_120 = arith.constant 3 : index
    %c1_121 = arith.constant 1 : index
    %c0_122 = arith.constant 0 : index
    %c0_123 = arith.constant 0 : index
    %118 = vector.load %arg2[%c3_120, %c1_121, %c0_122, %c0_123] : memref<4x4x4x8xbf16, #tpu.memory_space<vmem>>, vector<1x1x4x8xbf16>
    %119 = vector.shape_cast %118 : vector<1x1x4x8xbf16> to vector<4x8xbf16>
    %c0_124 = arith.constant 0 : index
    %c0_125 = arith.constant 0 : index
    %c12_126 = arith.constant 12 : index
    %120 = vector.load %arg1[%c0_124, %c0_125, %c12_126] : memref<1x8x128xbf16, #tpu.memory_space<vmem>>, vector<1x8x80xbf16>
    %121 = vector.shape_cast %120 : vector<1x8x80xbf16> to vector<8x80xbf16>
    %cst_127 = arith.constant dense<0.000000e+00> : vector<4x80xf32>
    %122 = tpu.matmul %119, %121, %cst_127 {dimension_numbers = #tpu.dot_dimension_numbers<[1], [0], [0], [1], [0, 0, 1, 1], [], []>} : vector<4x8xbf16>, vector<8x80xbf16>, vector<4x80xf32> -> vector<4x80xf32>
    %123 = arith.addf %117, %122 : vector<4x80xf32>
    %c3_128 = arith.constant 3 : index
    %c2_129 = arith.constant 2 : index
    %c0_130 = arith.constant 0 : index
    %c0_131 = arith.constant 0 : index
    %124 = vector.load %arg2[%c3_128, %c2_129, %c0_130, %c0_131] : memref<4x4x4x8xbf16, #tpu.memory_space<vmem>>, vector<1x1x4x8xbf16>
    %125 = vector.shape_cast %124 : vector<1x1x4x8xbf16> to vector<4x8xbf16>
    %c0_132 = arith.constant 0 : index
    %c0_133 = arith.constant 0 : index
    %c21_134 = arith.constant 21 : index
    %126 = vector.load %arg1[%c0_132, %c0_133, %c21_134] : memref<1x8x128xbf16, #tpu.memory_space<vmem>>, vector<1x8x80xbf16>
    %127 = vector.shape_cast %126 : vector<1x8x80xbf16> to vector<8x80xbf16>
    %cst_135 = arith.constant dense<0.000000e+00> : vector<4x80xf32>
    %128 = tpu.matmul %125, %127, %cst_135 {dimension_numbers = #tpu.dot_dimension_numbers<[1], [0], [0], [1], [0, 0, 1, 1], [], []>} : vector<4x8xbf16>, vector<8x80xbf16>, vector<4x80xf32> -> vector<4x80xf32>
    %129 = arith.addf %123, %128 : vector<4x80xf32>
    %c3_136 = arith.constant 3 : index
    %c3_137 = arith.constant 3 : index
    %c0_138 = arith.constant 0 : index
    %c0_139 = arith.constant 0 : index
    %130 = vector.load %arg2[%c3_136, %c3_137, %c0_138, %c0_139] : memref<4x4x4x8xbf16, #tpu.memory_space<vmem>>, vector<1x1x4x8xbf16>
    %131 = vector.shape_cast %130 : vector<1x1x4x8xbf16> to vector<4x8xbf16>
    %c0_140 = arith.constant 0 : index
    %c0_141 = arith.constant 0 : index
    %c22 = arith.constant 22 : index
    %132 = vector.load %arg1[%c0_140, %c0_141, %c22] : memref<1x8x128xbf16, #tpu.memory_space<vmem>>, vector<1x8x80xbf16>
    %133 = vector.shape_cast %132 : vector<1x8x80xbf16> to vector<8x80xbf16>
    %cst_142 = arith.constant dense<0.000000e+00> : vector<4x80xf32>
    %134 = tpu.matmul %131, %133, %cst_142 {dimension_numbers = #tpu.dot_dimension_numbers<[1], [0], [0], [1], [0, 0, 1, 1], [], []>} : vector<4x8xbf16>, vector<8x80xbf16>, vector<4x80xf32> -> vector<4x80xf32>
    %135 = arith.addf %129, %134 : vector<4x80xf32>
    %136 = arith.truncf %135 : vector<4x80xf32> to vector<4x80xbf16>
    %c0_143 = arith.constant 0 : index
    %c3_144 = arith.constant 3 : index
    %c0_145 = arith.constant 0 : index
    %c0_146 = arith.constant 0 : index
    %137 = vector.load %arg4[%c0_143, %c3_144, %c0_145, %c0_146] : memref<1x4x4x80xbf16, #tpu.memory_space<vmem>>, vector<1x1x4x80xbf16>
    %138 = vector.shape_cast %137 : vector<1x1x4x80xbf16> to vector<4x80xbf16>
    %139 = vector.shape_cast %136 : vector<4x80xbf16> to vector<1x1x4x80xbf16>
    tpu.vector_store %arg4[%c0_143, %c3_144, %c0_145, %c0_146], %139 {strides = array<i32>} : memref<1x4x4x80xbf16, #tpu.memory_space<vmem>>, vector<1x1x4x80xbf16>,
    %c0_147 = arith.constant 0 : index
    %c0_148 = arith.constant 0 : index
    %140 = vector.load %arg3[%c0_147, %c0_148] : memref<1x80xf32, #tpu.memory_space<vmem>>, vector<1x80xf32>
    %141 = vector.broadcast %140 : vector<1x80xf32> to vector<4x80xf32>
    %142 = arith.mulf %135, %141 : vector<4x80xf32>
    %cst_149 = arith.constant dense<0.000000e+00> : vector<4xf32>
    %143 = vector.multi_reduction <add>, %142, %cst_149 [1] : vector<4x80xf32> to vector<4xf32>
    %144 = vector.shape_cast %143 : vector<4xf32> to vector<4x1xf32>
    %145 = arith.addf %108, %144 : vector<4x1xf32>
    %146 = arith.mulf %142, %135 : vector<4x80xf32>
    %cst_150 = arith.constant dense<0.000000e+00> : vector<4xf32>
    %147 = vector.multi_reduction <add>, %146, %cst_150 [1] : vector<4x80xf32> to vector<4xf32>
    %148 = vector.shape_cast %147 : vector<4xf32> to vector<4x1xf32>
    %149 = arith.addf %112, %148 : vector<4x1xf32>
    %cst_151 = arith.constant 3.906250e-03 : f32
    %150 = vector.broadcast %cst_151 : f32 to vector<4x1xf32>
    %151 = arith.mulf %145, %150 : vector<4x1xf32>
    %cst_152 = arith.constant 3.906250e-03 : f32
    %152 = vector.broadcast %cst_152 : f32 to vector<4x1xf32>
    %153 = arith.mulf %149, %152 : vector<4x1xf32>
    %154 = arith.mulf %151, %151 : vector<4x1xf32>
    %155 = arith.subf %153, %154 : vector<4x1xf32>
    %cst_153 = arith.constant 0.000000e+00 : f32
    %156 = vector.broadcast %cst_153 : f32 to vector<4x1xf32>
    %157 = arith.maximumf %155, %156 : vector<4x1xf32>
    %cst_154 = arith.constant 9.99999974E-6 : f32
    %158 = vector.broadcast %cst_154 : f32 to vector<4x1xf32>
    %159 = arith.addf %157, %158 : vector<4x1xf32>
    %160 = math.rsqrt %159 : vector<4x1xf32>
    %c0_155 = arith.constant 0 : index
    %c0_156 = arith.constant 0 : index
    %c0_157 = arith.constant 0 : index
    %c0_158 = arith.constant 0 : index
    %161 = vector.load %arg4[%c0_155, %c0_156, %c0_157, %c0_158] : memref<1x4x4x80xbf16, #tpu.memory_space<vmem>>, vector<1x1x4x80xbf16>
    %162 = vector.shape_cast %161 : vector<1x1x4x80xbf16> to vector<4x80xbf16>
    %163 = arith.extf %162 : vector<4x80xbf16> to vector<4x80xf32>
    %164 = vector.broadcast %151 : vector<4x1xf32> to vector<4x80xf32>
    %165 = arith.subf %163, %164 : vector<4x80xf32>
    %166 = vector.broadcast %160 : vector<4x1xf32> to vector<4x80xf32>
    %167 = arith.mulf %165, %166 : vector<4x80xf32>
    %cst_159 = arith.constant 0.000000e+00 : f32
    %168 = vector.broadcast %cst_159 : f32 to vector<4x80xf32>
    %169 = arith.maximumf %167, %168 : vector<4x80xf32>
    %170 = arith.truncf %169 : vector<4x80xf32> to vector<4x80xbf16>
    %c0_160 = arith.constant 0 : index
    %c0_161 = arith.constant 0 : index
    %c0_162 = arith.constant 0 : index
    %c0_163 = arith.constant 0 : index
    %171 = vector.load %arg4[%c0_160, %c0_161, %c0_162, %c0_163] : memref<1x4x4x80xbf16, #tpu.memory_space<vmem>>, vector<1x1x4x80xbf16>
    %172 = vector.shape_cast %171 : vector<1x1x4x80xbf16> to vector<4x80xbf16>
    %173 = vector.shape_cast %170 : vector<4x80xbf16> to vector<1x1x4x80xbf16>
    tpu.vector_store %arg4[%c0_160, %c0_161, %c0_162, %c0_163], %173 {strides = array<i32>} : memref<1x4x4x80xbf16, #tpu.memory_space<vmem>>, vector<1x1x4x80xbf16>,
    %c0_164 = arith.constant 0 : index
    %c1_165 = arith.constant 1 : index
    %c0_166 = arith.constant 0 : index
    %c0_167 = arith.constant 0 : index
    %174 = vector.load %arg4[%c0_164, %c1_165, %c0_166, %c0_167] : memref<1x4x4x80xbf16, #tpu.memory_space<vmem>>, vector<1x1x4x80xbf16>
    %175 = vector.shape_cast %174 : vector<1x1x4x80xbf16> to vector<4x80xbf16>
    %176 = arith.extf %175 : vector<4x80xbf16> to vector<4x80xf32>
    %177 = vector.broadcast %151 : vector<4x1xf32> to vector<4x80xf32>
    %178 = arith.subf %176, %177 : vector<4x80xf32>
    %179 = vector.broadcast %160 : vector<4x1xf32> to vector<4x80xf32>
    %180 = arith.mulf %178, %179 : vector<4x80xf32>
    %cst_168 = arith.constant 0.000000e+00 : f32
    %181 = vector.broadcast %cst_168 : f32 to vector<4x80xf32>
    %182 = arith.maximumf %180, %181 : vector<4x80xf32>
    %183 = arith.truncf %182 : vector<4x80xf32> to vector<4x80xbf16>
    %c0_169 = arith.constant 0 : index
    %c1_170 = arith.constant 1 : index
    %c0_171 = arith.constant 0 : index
    %c0_172 = arith.constant 0 : index
    %184 = vector.load %arg4[%c0_169, %c1_170, %c0_171, %c0_172] : memref<1x4x4x80xbf16, #tpu.memory_space<vmem>>, vector<1x1x4x80xbf16>
    %185 = vector.shape_cast %184 : vector<1x1x4x80xbf16> to vector<4x80xbf16>
    %186 = vector.shape_cast %183 : vector<4x80xbf16> to vector<1x1x4x80xbf16>
    tpu.vector_store %arg4[%c0_169, %c1_170, %c0_171, %c0_172], %186 {strides = array<i32>} : memref<1x4x4x80xbf16, #tpu.memory_space<vmem>>, vector<1x1x4x80xbf16>,
    %c0_173 = arith.constant 0 : index
    %c2_174 = arith.constant 2 : index
    %c0_175 = arith.constant 0 : index
    %c0_176 = arith.constant 0 : index
    %187 = vector.load %arg4[%c0_173, %c2_174, %c0_175, %c0_176] : memref<1x4x4x80xbf16, #tpu.memory_space<vmem>>, vector<1x1x4x80xbf16>
    %188 = vector.shape_cast %187 : vector<1x1x4x80xbf16> to vector<4x80xbf16>
    %189 = arith.extf %188 : vector<4x80xbf16> to vector<4x80xf32>
    %190 = vector.broadcast %151 : vector<4x1xf32> to vector<4x80xf32>
    %191 = arith.subf %189, %190 : vector<4x80xf32>
    %192 = vector.broadcast %160 : vector<4x1xf32> to vector<4x80xf32>
    %193 = arith.mulf %191, %192 : vector<4x80xf32>
    %cst_177 = arith.constant 0.000000e+00 : f32
    %194 = vector.broadcast %cst_177 : f32 to vector<4x80xf32>
    %195 = arith.maximumf %193, %194 : vector<4x80xf32>
    %196 = arith.truncf %195 : vector<4x80xf32> to vector<4x80xbf16>
    %c0_178 = arith.constant 0 : index
    %c2_179 = arith.constant 2 : index
    %c0_180 = arith.constant 0 : index
    %c0_181 = arith.constant 0 : index
    %197 = vector.load %arg4[%c0_178, %c2_179, %c0_180, %c0_181] : memref<1x4x4x80xbf16, #tpu.memory_space<vmem>>, vector<1x1x4x80xbf16>
    %198 = vector.shape_cast %197 : vector<1x1x4x80xbf16> to vector<4x80xbf16>
    %199 = vector.shape_cast %196 : vector<4x80xbf16> to vector<1x1x4x80xbf16>
    tpu.vector_store %arg4[%c0_178, %c2_179, %c0_180, %c0_181], %199 {strides = array<i32>} : memref<1x4x4x80xbf16, #tpu.memory_space<vmem>>, vector<1x1x4x80xbf16>,
    %c0_182 = arith.constant 0 : index
    %c3_183 = arith.constant 3 : index
    %c0_184 = arith.constant 0 : index
    %c0_185 = arith.constant 0 : index
    %200 = vector.load %arg4[%c0_182, %c3_183, %c0_184, %c0_185] : memref<1x4x4x80xbf16, #tpu.memory_space<vmem>>, vector<1x1x4x80xbf16>
    %201 = vector.shape_cast %200 : vector<1x1x4x80xbf16> to vector<4x80xbf16>
    %202 = arith.extf %201 : vector<4x80xbf16> to vector<4x80xf32>
    %203 = vector.broadcast %151 : vector<4x1xf32> to vector<4x80xf32>
    %204 = arith.subf %202, %203 : vector<4x80xf32>
    %205 = vector.broadcast %160 : vector<4x1xf32> to vector<4x80xf32>
    %206 = arith.mulf %204, %205 : vector<4x80xf32>
    %cst_186 = arith.constant 0.000000e+00 : f32
    %207 = vector.broadcast %cst_186 : f32 to vector<4x80xf32>
    %208 = arith.maximumf %206, %207 : vector<4x80xf32>
    %209 = arith.truncf %208 : vector<4x80xf32> to vector<4x80xbf16>
    %c0_187 = arith.constant 0 : index
    %c3_188 = arith.constant 3 : index
    %c0_189 = arith.constant 0 : index
    %c0_190 = arith.constant 0 : index
    %210 = vector.load %arg4[%c0_187, %c3_188, %c0_189, %c0_190] : memref<1x4x4x80xbf16, #tpu.memory_space<vmem>>, vector<1x1x4x80xbf16>
    %211 = vector.shape_cast %210 : vector<1x1x4x80xbf16> to vector<4x80xbf16>
    %212 = vector.shape_cast %209 : vector<4x80xbf16> to vector<1x1x4x80xbf16>
    tpu.vector_store %arg4[%c0_187, %c3_188, %c0_189, %c0_190], %212 {strides = array<i32>} : memref<1x4x4x80xbf16, #tpu.memory_space<vmem>>, vector<1x1x4x80xbf16>,
    return
  }
  func.func @transform_0(%arg0: i32) -> (i32, i32, i32) {
    %c0_i32 = arith.constant 0 : i32
    %c0_i32_0 = arith.constant 0 : i32
    %c0_i32_1 = arith.constant 0 : i32
    return %arg0, %c0_i32, %c0_i32_0 : i32, i32, i32
  }
  func.func @transform_1(%arg0: i32) -> (i32, i32, i32, i32) {
    %c0_i32 = arith.constant 0 : i32
    %c0_i32_0 = arith.constant 0 : i32
    %c0_i32_1 = arith.constant 0 : i32
    %c0_i32_2 = arith.constant 0 : i32
    %c0_i32_3 = arith.constant 0 : i32
    return %c0_i32, %c0_i32_0, %c0_i32_1, %c0_i32_2 : i32, i32, i32, i32
  }
  func.func @transform_2(%arg0: i32) -> (i32, i32) {
    %c0_i32 = arith.constant 0 : i32
    %c0_i32_0 = arith.constant 0 : i32
    %c0_i32_1 = arith.constant 0 : i32
    return %c0_i32, %c0_i32_0 : i32, i32
  }
  func.func @transform_3(%arg0: i32) -> (i32, i32, i32, i32) {
    %c0_i32 = arith.constant 0 : i32
    %c0_i32_0 = arith.constant 0 : i32
    %c0_i32_1 = arith.constant 0 : i32
    %c0_i32_2 = arith.constant 0 : i32
    return %arg0, %c0_i32, %c0_i32_0, %c0_i32_1 : i32, i32, i32, i32
  }
}

</mosaic_0001>

<bundles_post_ra>
// kernel: unet_up_loc_forward.1
= control target key start
LH: loop header
LB: loop body
LE: loop exit
PB: predicated region body
PF: predicated region fallthrough
CT: control target
= control target key end

     0   :  { %s1460_s12 = smov 0   ;;  %s1642_s0 = inlined_call_operand.vmem [shape: bf16[2,8,128], index: 0, kind: input, shape index: {}]   ;;  %s1643_s1 = inlined_call_operand.vmem [shape: bf16[4,4,4,8], index: 1, kind: input, shape index: {}]   ;;  %s1644_s2 = inlined_call_operand.vmem [shape: f32[1,80], index: 2, kind: input, shape index: {}]   ;;  %s1645_s3 = inlined_call_operand.vmem [shape: bf16[2,4,4,80], index: 3, kind: output, shape index: {}]  }
   0x1 LB: > { %s1163_s13 = sadd.s32 4294967295, %s1428_s12   ;;  %p1167_p0 = scmp.ge.s32.totalorder %s1428_s12, 1  ;;  %s1428_s12 = sphi %s1460_s12, %s13_s12  }
   0x2   : > { %p136_p1 = scmp.lt.s32.totalorder %s1428_s12, 3 }
   0x4   : > { %p137_p2 = pnand %p1167_p0, %p136_p1 }
   0x5   : > { %p159_p3 = scmp.lt.s32.totalorder (!%p137_p2), %s1163_s13, 1  ;;  %v1430_v0 = vmov (!%p137_p2), 0.0   ;;  %vm1431_vm0 = vmmov (!%p137_p2), 0   ;;  %s1432_s18 = smov (!%p137_p2), 127   ;;  %vm182_vm1 = vcmask (!%p137_p2), 1043456   ;;  %vm178_vm2 = vcmask (!%p137_p2), 64512  }
   0x6   : > { %140 = sbr.rel (%p137_p2) target bundleno = 610 (0x262), region = 32  ;;  %1254 = vmatprep.subr.bf16.mxu0 (!%p137_p2), %v1430_v0  ;;  %1256 = vmatprep.mubr.msk.bf16.mxu0 (!%p137_p2), %vm1431_vm0, %v1430_v0  ;;  %s1433_s19 = smov (!%p137_p2), 118   ;;  %v1171_v8 = vld [vmem:[%s1643_s1 + $0x2] sm:$0x3] (!%p137_p2)  ;;  %v1181_v13 = vld [vmem:[%s1643_s1 + $0xa] sm:$0x3] (!%p137_p2) }
   0x7   : > { %1278 = vmatprep.subr.bf16.mxu1 (!%p137_p2), %v1430_v0  ;;  %1280 = vmatprep.mubr.msk.bf16.mxu1 (!%p137_p2), %vm1431_vm0, %v1430_v0  ;;  %s1434_s20 = smov (!%p137_p2), 126   ;;  %s1435_s21 = smov (!%p137_p2), 117   ;;  %v169_v16 = vld [vmem:[%s1643_s1] sm:$0x3] (!%p137_p2)  ;;  %v1180_v19 = vld [vmem:[%s1643_s1 + $0x8] sm:$0x3] (!%p137_p2) }
   0x8   : > { %s1436_s22 = smov (!%p137_p2), 116   ;;  %s1437_s23 = smov (!%p137_p2), 108   ;;  %v1175_v22 = vld [vmem:[%s1643_s1 + $0x4] sm:$0x3] (!%p137_p2)  ;;  %v1185_v25 = vld [vmem:[%s1643_s1 + $0xc] sm:$0x3] (!%p137_p2) }
   0x9   : > { %s1438_s24 = smov (!%p137_p2), 107   ;;  %s1439_s25 = smov (!%p137_p2), 106   ;;  %v1177_v28 = vld [vmem:[%s1643_s1 + $0x6] sm:$0x3] (!%p137_p2)  ;;  %v1187_v31 = vld [vmem:[%s1643_s1 + $0xe] sm:$0x3] (!%p137_p2) }
   0xa   : > { %v1192_v34 = vld [vmem:[%s1643_s1 + $0x12] sm:$0x3] (!%p137_p2)  ;;  %v1203_v37 = vld [vmem:[%s1643_s1 + $0x1a] sm:$0x3] (!%p137_p2)  ;;  %v1191_v40 = vld [vmem:[%s1643_s1 + $0x10] sm:$0x3] (!%p137_p2) }
   0xb   : > { %v1202_v43 = vld [vmem:[%s1643_s1 + $0x18] sm:$0x3] (!%p137_p2)  ;;  %v1196_v46 = vld [vmem:[%s1643_s1 + $0x14] sm:$0x3] (!%p137_p2)  ;;  %v1207_v49 = vld [vmem:[%s1643_s1 + $0x1c] sm:$0x3] (!%p137_p2) }
   0xc   : > { %v1198_v51 = vld [vmem:[%s1643_s1 + $0x16] sm:$0x3] (!%p137_p2)  ;;  %v1209_v52 = vld [vmem:[%s1643_s1 + $0x1e] sm:$0x3] (!%p137_p2)  ;;  %v1179_v53 = vld [vmem:[%s1644_s2] ss:$0 sm:$0xff] (!%p137_p2) }
   0xd   : > { %s1647_s13 = smov (!%p159_p3, %s1163_s13), 1  ;;  %vm375_vm3 = vcmask 648192   ;;  %vm385_vm4 = vcmask 650240  }
   0xe   : > { %s1168_s14 = sshll.u32 %s1647_s13, 2  ;;  %s1221_s6 = sshll.u32 %s1647_s13, 3 }
   0xf   : > { %s162_s17 = scalar_lea.vmem %s1642_s0, %s1168_s14  ;;  %s1609_s11 = scalar_lea.vmem %s1645_s3, %s1221_s6 }
  0x10   : > { %v170_v1 = vld [vmem:[%s162_s17] sm:$0xf] }
  0x11   : > { %v1417_v2 = vld [vmem:[%s162_s17] ss:$0 sps:$4 sm:$0xff]   ;;  %v1172_v3 = vcombine.low %v170_v1, %v170_v1  ;;  %v230_v9 = vsel %vm182_vm1, %v170_v1, 0 }
  0x12   : > { %451 = vrot.lane.b32.xlu1 %v1417_v2, %s1432_s18  ;;  %v1418_v4 = vld [vmem:[%s162_s17] ss:$0 sps:$4 sm:$0xff]  }
  0x13   : > { %176 = vrot.lane.b32.xlu0 %v1172_v3, %s1432_s18  ;;  %v1419_v5 = vld [vmem:[%s162_s17] ss:$0 sps:$4 sm:$0xff]  }
  0x16   : > { %274 = vrot.lane.b32.xlu1 %v1172_v3, %s1433_s19 }
  0x17   : > { %403 = vrot.lane.b32.xlu0 %v1417_v2, %s1434_s20 }
  0x1a   : > { %325 = vrot.lane.b32.xlu1 %v1172_v3, %s1435_s21 }
  0x1b   : > { %501 = vrot.lane.b32.xlu0 %v1417_v2, %s1435_s21 }
  0x1e   : > { %629 = vrot.lane.b32.xlu1 %v1418_v4, %s1435_s21 }
  0x1f   : > { %552 = vrot.lane.b32.xlu0 %v1417_v2, %s1436_s22 }
  0x22   : > { %677 = vrot.lane.b32.xlu1 %v1418_v4, %s1433_s19 }
  0x23   : > { %855 = vrot.lane.b32.xlu0 %v1419_v5, %s1436_s22 }
  0x26   : > { %727 = vrot.lane.b32.xlu1 %v1418_v4, %s1437_s23 }
  0x27   : > { %903 = vrot.lane.b32.xlu0 %v1419_v5, %s1435_s21 }
  0x2a   : > { %778 = vrot.lane.b32.xlu1 %v1418_v4, %s1438_s24 }
  0x2b   : > { %953 = vrot.lane.b32.xlu0 %v1419_v5, %s1438_s24 }
  0x2f   : > { %1004 = vrot.lane.b32.xlu0 %v1419_v5, %s1439_s25 }
  0x84   : > { %v452_v11 = vpop.permute.xlu1 %451 }
  0x85   : > { %v177_v6 = vpop.permute.xlu0 %176  ;;  %v457_v14 = vsel %vm182_vm1, %v452_v11, 0 }
  0x86   : > { %v184_v7 = vsel %vm182_vm1, %v177_v6, 0 }
  0x87   : > { %1255 = vmatpush3.bf16.msra.mxu0 %v184_v7 }
  0x88   : > { %1260 = vmatprep.subr.bf16.mxu0 %v1430_v0  ;;  %v275_v15 = vpop.permute.xlu1 %274 }
  0x89   : > { %v404_v10 = vpop.permute.xlu0 %403  ;;  %v280_v17 = vsel %vm182_vm1, %v275_v15, 0 }
  0x8a   : > { %1257 = vmatmul.mubr.msk.bf16.vlgmr.msra.gmra.mrb[0].mxu0 %vm178_vm2, %v1171_v8  ;;  %v409_v12 = vsel %vm182_vm1, %v404_v10, 0 }
  0x8b   : > { %1261 = vmatpush3.bf16.msra.mxu0 %v230_v9  ;;  %1279 = vmatpush3.bf16.msra.mxu1 %v409_v12 }
  0x8c   : > { %1284 = vmatprep.subr.bf16.mxu1 %v1430_v0  ;;  %1262 = vmatprep.mubr.msk.bf16.mxu0 %vm1431_vm0, %v1430_v0  ;;  %v326_v21 = vpop.permute.xlu1 %325 }
  0x8d   : > { %1266 = vmatprep.subr.bf16.mxu0 %v1430_v0  ;;  %v502_v18 = vpop.permute.xlu0 %501  ;;  %v331_v23 = vsel %vm182_vm1, %v326_v21, 0 }
  0x8e   : > { %1281 = vmatmul.mubr.msk.bf16.vlgmr.msra.gmra.mrb[0].mxu1 %vm178_vm2, %v1181_v13  ;;  %v507_v20 = vsel %vm182_vm1, %v502_v18, 0 }
  0x8f   : > { %1285 = vmatpush3.bf16.msra.mxu1 %v457_v14  ;;  %1286 = vmatprep.mubr.msk.bf16.mxu1 %vm1431_vm0, %v1430_v0 }
  0x90   : > { %1290 = vmatprep.subr.bf16.mxu1 %v1430_v0  ;;  %v630_v27 = vpop.permute.xlu1 %629 }
  0x91   : > { %v553_v24 = vpop.permute.xlu0 %552  ;;  %v635_v29 = vsel %vm182_vm1, %v630_v27, 0 }
  0x92   : > { %v558_v26 = vsel %vm182_vm1, %v553_v24, 0 }
  0x94   : > { %v678_v33 = vpop.permute.xlu1 %677 }
  0x95   : > { %v856_v30 = vpop.permute.xlu0 %855  ;;  %v683_v35 = vsel %vm182_vm1, %v678_v33, 0 }
  0x96   : > { %1263 = vmatmul.mubr.msk.bf16.vlgmr.msra.gmra.mrb[0].mxu0 %vm178_vm2, %v169_v16  ;;  %v861_v32 = vsel %vm182_vm1, %v856_v30, 0 }
  0x97   : > { %1267 = vmatpush3.bf16.msra.mxu0 %v280_v17  ;;  %1268 = vmatprep.mubr.msk.bf16.mxu0 %vm1431_vm0, %v1430_v0 }
  0x98   : > { %1272 = vmatprep.subr.bf16.mxu0 %v1430_v0  ;;  %v728_v39 = vpop.permute.xlu1 %727 }
  0x99   : > { %v904_v36 = vpop.permute.xlu0 %903  ;;  %v733_v41 = vsel %vm182_vm1, %v728_v39, 0 }
  0x9a   : > { %1287 = vmatmul.mubr.msk.bf16.vlgmr.msra.gmra.mrb[0].mxu1 %vm178_vm2, %v1180_v19  ;;  %v909_v38 = vsel %vm182_vm1, %v904_v36, 0 }
  0x9b   : > { %1291 = vmatpush3.bf16.msra.mxu1 %v507_v20  ;;  %1292 = vmatprep.mubr.msk.bf16.mxu1 %vm1431_vm0, %v1430_v0 }
  0x9c   : > { %1296 = vmatprep.subr.bf16.mxu1 %v1430_v0  ;;  %v779_v45 = vpop.permute.xlu1 %778 }
  0x9d   : > { %v954_v42 = vpop.permute.xlu0 %953  ;;  %v784_v47 = vsel %vm182_vm1, %v779_v45, 0 }
  0x9e   : > { %v959_v44 = vsel %vm182_vm1, %v954_v42, 0 }
  0xa1   : > { %v1005_v48 = vpop.permute.xlu0 %1004 }
  0xa2   : > { %1269 = vmatmul.mubr.msk.bf16.vlgmr.msra.gmra.mrb[0].mxu0 %vm178_vm2, %v1175_v22  ;;  %v1010_v50 = vsel %vm182_vm1, %v1005_v48, 0 }
  0xa3   : > { %1273 = vmatpush3.bf16.msra.mxu0 %v331_v23  ;;  %1274 = vmatprep.mubr.msk.bf16.mxu0 %vm1431_vm0, %v1430_v0 }
  0xa4   : > { %1302 = vmatprep.subr.bf16.mxu0 %v1430_v0 }
  0xa6   : > { %1293 = vmatmul.mubr.msk.bf16.vlgmr.msra.gmra.mrb[0].mxu1 %vm178_vm2, %v1185_v25 }
  0xa7   : > { %1297 = vmatpush3.bf16.msra.mxu1 %v558_v26  ;;  %1298 = vmatprep.mubr.msk.bf16.mxu1 %vm1431_vm0, %v1430_v0 }
  0xa8   : > { %1326 = vmatprep.subr.bf16.mxu1 %v1430_v0 }
  0xae   : > { %1275 = vmatmul.mubr.msk.bf16.vlgmr.msra.gmra.mrb[0].mxu0 %vm178_vm2, %v1177_v28 }
  0xaf   : > { %1303 = vmatpush3.bf16.msra.mxu0 %v635_v29  ;;  %1304 = vmatprep.mubr.msk.bf16.mxu0 %vm1431_vm0, %v1430_v0 }
  0xb0   : > { %1308 = vmatprep.subr.bf16.mxu0 %v1430_v0 }
  0xb2   : > { %1299 = vmatmul.mubr.msk.bf16.vlgmr.msra.gmra.mrb[0].mxu1 %vm178_vm2, %v1187_v31 }
  0xb3   : > { %1327 = vmatpush3.bf16.msra.mxu1 %v861_v32  ;;  %1328 = vmatprep.mubr.msk.bf16.mxu1 %vm1431_vm0, %v1430_v0 }
  0xb4   : > { %1332 = vmatprep.subr.bf16.mxu1 %v1430_v0 }
  0xb6   : > { %1305 = vmatmul.mubr.msk.bf16.vlgmr.msra.gmra.mrb[4].mxu0 %vm178_vm2, %v1192_v34 }
  0xb7   : > { %1309 = vmatpush3.bf16.msra.mxu0 %v683_v35  ;;  %1310 = vmatprep.mubr.msk.bf16.mxu0 %vm1431_vm0, %v1430_v0 }
  0xb8   : > { %1314 = vmatprep.subr.bf16.mxu0 %v1430_v0 }
  0xba   : > { %1329 = vmatmul.mubr.msk.bf16.vlgmr.msra.gmra.mrb[4].mxu1 %vm178_vm2, %v1203_v37 }
  0xbb   : > { %1333 = vmatpush3.bf16.msra.mxu1 %v909_v38  ;;  %1334 = vmatprep.mubr.msk.bf16.mxu1 %vm1431_vm0, %v1430_v0 }
  0xbc   : > { %1338 = vmatprep.subr.bf16.mxu1 %v1430_v0 }
  0xc2   : > { %1311 = vmatmul.mubr.msk.bf16.vlgmr.msra.gmra.mrb[4].mxu0 %vm178_vm2, %v1191_v40 }
  0xc3   : > { %1315 = vmatpush3.bf16.msra.mxu0 %v733_v41  ;;  %1316 = vmatprep.mubr.msk.bf16.mxu0 %vm1431_vm0, %v1430_v0 }
  0xc4   : > { %1320 = vmatprep.subr.bf16.mxu0 %v1430_v0 }
  0xc6   : > { %1335 = vmatmul.mubr.msk.bf16.vlgmr.msra.gmra.mrb[4].mxu1 %vm178_vm2, %v1202_v43 }
  0xc7   : > { %1339 = vmatpush3.bf16.msra.mxu1 %v959_v44  ;;  %1340 = vmatprep.mubr.msk.bf16.mxu1 %vm1431_vm0, %v1430_v0 }
  0xc8   : > { %1344 = vmatprep.subr.bf16.mxu1 %v1430_v0 }
  0xce   : > { %1317 = vmatmul.mubr.msk.bf16.vlgmr.msra.gmra.mrb[4].mxu0 %vm178_vm2, %v1196_v46 }
  0xcf   : > { %1321 = vmatpush3.bf16.msra.mxu0 %v784_v47  ;;  %1322 = vmatprep.mubr.msk.bf16.mxu0 %vm1431_vm0, %v1430_v0 }
  0xd2   : > { %1341 = vmatmul.mubr.msk.bf16.vlgmr.msra.gmra.mrb[4].mxu1 %vm178_vm2, %v1207_v49 }
  0xd3   : > { %1345 = vmatpush3.bf16.msra.mxu1 %v1010_v50  ;;  %1346 = vmatprep.mubr.msk.bf16.mxu1 %vm1431_vm0, %v1430_v0 }
  0xda   : > { %1323 = vmatmul.mubr.msk.bf16.vlgmr.msra.gmra.mrb[4].mxu0 %vm178_vm2, %v1198_v51 }
  0xde   : > { %1347 = vmatmul.mubr.msk.bf16.vlgmr.msra.gmra.mrb[4].mxu1 %vm178_vm2, %v1209_v52 }
 0x181   : > { %v367_v54 = vpop.f32.mrb[0].mxu0 }
 0x182   : > { %v374_v55 = vpack.c.bf16 %v367_v54, %v367_v54  ;;  %v1276_v56 = vpop.f32.mrb[1].mxu0  ;;  %v384_v57 = vmul.f32 %v1179_v53, %v367_v54 }
 0x183   : > { %v370_v58 = vpop.f32.mrb[2].mxu0 }
 0x184   : > { %376 = vst.msk [vmem:[%s1609_s11] sm:$0x3] %vm375_vm3, %v374_v55  ;;  %v1277_v59 = vpop.f32.mrb[3].mxu0  ;;  %v386_v60 = vsel %vm385_vm4, %v384_v57, 0.0  ;;  %v390_v5 = vmul.f32 %v384_v57, %v367_v54 }
 0x185   : > { %387 = vadd.xlane.f32.xlu1 %v386_v60  ;;  %v594_v61 = vpop.f32.mrb[0].mxu1 }
 0x186   : > { %v601_v62 = vpack.c.bf16 %v594_v61, %v594_v61  ;;  %v1300_v63 = vpop.f32.mrb[1].mxu1  ;;  %v611_v0 = vmul.f32 %v1179_v53, %v594_v61  ;;  %v391_v7 = vsel %vm385_vm4, %v390_v5, 0.0 }
 0x187   : > { %v597_v1 = vpop.f32.mrb[2].mxu1 }
 0x188   : > { %1189 = vst.msk [vmem:[%s1609_s11 + $0x2] sm:$0x3] %vm375_vm3, %v601_v62  ;;  %v1301_v2 = vpop.f32.mrb[3].mxu1  ;;  %v612_v3 = vsel %vm385_vm4, %v611_v0, 0.0  ;;  %v616_v4 = vmul.f32 %v611_v0, %v594_v61 }
 0x189   : > { %613 = vadd.xlane.f32.xlu0 %v612_v3 }
 0x18a   : > { %v617_v6 = vsel %vm385_vm4, %v616_v4, 0.0 }
 0x18b   : > { %618 = vadd.xlane.f32.xlu1 %v617_v6  ;;  %v1080_v46 = vld [vmem:[%s1609_s11] sm:$0x3] }
 0x18c   : > { %v1081_v50 = vunpack.c.l.bf16 %v1080_v46 }
 0x18d   : > { %392 = vadd.xlane.f32.xlu0 %v391_v7 }
 0x18f   : > { %v1213_v47 = vld [vmem:[%s1609_s11 + $0x2] sm:$0x3] }
 0x190   : > { %v1088_v51 = vunpack.c.l.bf16 %v1213_v47 }
 0x1ad   : > { %v820_v8 = vpop.f32.mrb[4].mxu0 }
 0x1ae   : > { %v827_v9 = vpack.c.bf16 %v820_v8, %v820_v8  ;;  %v1324_v10 = vpop.f32.mrb[5].mxu0  ;;  %v837_v11 = vmul.f32 %v1179_v53, %v820_v8 }
 0x1af   : > { %v823_v12 = vpop.f32.mrb[6].mxu0 }
 0x1b0   : > { %1200 = vst.msk [vmem:[%s1609_s11 + $0x4] sm:$0x3] %vm375_vm3, %v827_v9  ;;  %v1325_v13 = vpop.f32.mrb[7].mxu0  ;;  %v838_v14 = vsel %vm385_vm4, %v837_v11, 0.0  ;;  %v842_v15 = vmul.f32 %v837_v11, %v820_v8 }
 0x1b1   : > { %839 = vadd.xlane.f32.xlu0 %v838_v14  ;;  %v1046_v16 = vpop.f32.mrb[4].mxu1 }
 0x1b2   : > { %v1053_v17 = vpack.c.bf16 %v1046_v16, %v1046_v16  ;;  %v1348_v18 = vpop.f32.mrb[5].mxu1  ;;  %v843_v19 = vsel %vm385_vm4, %v842_v15, 0.0  ;;  %v1063_v20 = vmul.f32 %v1179_v53, %v1046_v16 }
 0x1b3   : > { %844 = vadd.xlane.f32.xlu1 %v843_v19  ;;  %v1049_v21 = vpop.f32.mrb[6].mxu1 }
 0x1b4   : > { %1211 = vst.msk [vmem:[%s1609_s11 + $0x6] sm:$0x3] %vm375_vm3, %v1053_v17  ;;  %v1349_v22 = vpop.f32.mrb[7].mxu1  ;;  %v1064_v23 = vsel %vm385_vm4, %v1063_v20, 0.0  ;;  %v1068_v24 = vmul.f32 %v1063_v20, %v1046_v16 }
 0x1b5   : > { %1065 = vadd.xlane.f32.xlu0 %v1064_v23 }
 0x1b6   : > { %v1069_v25 = vsel %vm385_vm4, %v1068_v24, 0.0 }
 0x1b7   : > { %1070 = vadd.xlane.f32.xlu1 %v1069_v25  ;;  %v1215_v48 = vld [vmem:[%s1609_s11 + $0x4] sm:$0x3] }
 0x1b8   : > { %v1095_v52 = vunpack.c.l.bf16 %v1215_v48 }
 0x1bb   : > { %v1217_v49 = vld [vmem:[%s1609_s11 + $0x6] sm:$0x3] }
 0x1bc   : > { %v1102_v53 = vunpack.c.l.bf16 %v1217_v49 }
 0x212   : > { %v388_v27 = vpop.xlane.xlu1 %387 }
 0x216   : > { %v614_v26 = vpop.xlane.xlu0 %613 }
 0x217   : > { %v615_v31 = vadd.f32 %v614_v26, %v388_v27 }
 0x218   : > { %v619_v29 = vpop.xlane.xlu1 %618 }
 0x21a   : > { %v393_v28 = vpop.xlane.xlu0 %392 }
 0x21b   : > { %v620_v33 = vadd.f32 %v619_v29, %v393_v28 }
 0x23e   : > { %v840_v30 = vpop.xlane.xlu0 %839 }
 0x23f   : > { %v841_v34 = vadd.f32 %v840_v30, %v615_v31 }
 0x240   : > { %v845_v32 = vpop.xlane.xlu1 %844 }
 0x241   : > { %v846_v36 = vadd.f32 %v845_v32, %v620_v33 }
 0x242   : > { %v1066_v35 = vpop.xlane.xlu0 %1065 }
 0x243   : > { %v1067_v37 = vadd.f32 %v1066_v35, %v841_v34 }
 0x244   : > { %v1071_v38 = vpop.xlane.xlu1 %1070 }
 0x245   : > { %v1073_v39 = vmul.f32 0.00390625, %v1067_v37  ;;  %v1072_v40 = vadd.f32 %v1071_v38, %v846_v36 }
 0x247   : > { %v1074_v41 = vmul.f32 0.00390625, %v1072_v40  ;;  %v1075_v42 = vmul.f32 %v1073_v39, %v1073_v39  ;;  %v1082_v54 = vsub.f32 %v1081_v50, %v1073_v39  ;;  %v1089_v55 = vsub.f32 %v1088_v51, %v1073_v39 }
 0x248   : > { %v1096_v56 = vsub.f32 %v1095_v52, %v1073_v39  ;;  %v1103_v57 = vsub.f32 %v1102_v53, %v1073_v39 }
 0x249   : > { %v1076_v43 = vsub.f32 %v1074_v41, %v1075_v42 }
 0x24b   : > { %v1077_v44 = vmax.f32 %v1076_v43, 0.0 }
 0x24d   : > { %v1078_v45 = vadd.f32 1e-05, %v1077_v44 }
 0x24f   : > { %1420 = vrsqrt.f32 %v1078_v45 }
 0x259   : > { %v1421_v58 = vpop.eup %1420 }
 0x25a   : > { %v1083_v59 = vmul.f32 %v1421_v58, %v1082_v54  ;;  %v1090_v60 = vmul.f32 %v1421_v58, %v1089_v55  ;;  %v1097_v61 = vmul.f32 %v1421_v58, %v1096_v56  ;;  %v1104_v62 = vmul.f32 %v1421_v58, %v1103_v57 }
 0x25c   : > { %v1084_v63 = vmax.f32 %v1083_v59, 0.0  ;;  %v1091_v0 = vmax.f32 %v1090_v60, 0.0  ;;  %v1098_v1 = vmax.f32 %v1097_v61, 0.0  ;;  %v1105_v2 = vmax.f32 %v1104_v62, 0.0 }
 0x25e   : > { %v1085_v3 = vpack.c.bf16 %v1084_v63, %v1084_v63  ;;  %v1092_v4 = vpack.c.bf16 %v1091_v0, %v1091_v0  ;;  %v1099_v5 = vpack.c.bf16 %v1098_v1, %v1098_v1  ;;  %v1106_v6 = vpack.c.bf16 %v1105_v2, %v1105_v2 }
 0x260   : > { %1086 = vst.msk [vmem:[%s1609_s11] sm:$0x3] %vm375_vm3, %v1085_v3  ;;  %1214 = vst.msk [vmem:[%s1609_s11 + $0x2] sm:$0x3] %vm375_vm3, %v1092_v4 }
 0x261   : > { %1216 = vst.msk [vmem:[%s1609_s11 + $0x4] sm:$0x3] %vm375_vm3, %v1099_v5  ;;  %1218 = vst.msk [vmem:[%s1609_s11 + $0x6] sm:$0x3] %vm375_vm3, %v1106_v6 }
 0x262 PF: > { %s13_s12 = sadd.s32 1, %s1428_s12  }
 0x263   : > { %p10_p4 = scmp.ge.s32.totalorder %s13_s12, 4  }
 0x265   :  { %12 = sbr.rel (!%p10_p4) target bundleno = 1 (0x1), region = 80 }

</bundles_post_ra>
